<compile_context>
chip_gen: v5e
topology: v5e:2x2
jax: 0.10.0
libtpu: 0.0.40
codegen_flags: <defaults>
</compile_context>

<pallas_src>
import functools

import jax
import jax.numpy as jnp
from jax.experimental import pallas as pl
from jax.experimental.pallas import tpu as pltpu

NEG_SLOPE = 0.01    # torch.nn.functional.leaky_relu default negative_slope
LANE = 128
SUBLANE = 8
MAX_BATCH_TILE = 256    # batch rows per grid step once the batch grows


def _round_up(n, m):
    return ((n + m - 1) // m) * m


def _fused_mlp_kernel(x_ref, *refs, num_layers, d_in):
    """Whole MLP for one batch tile.

    Matmuls run on the MXU with bf16 operands and f32 accumulation; the
    bias-add + leaky_relu epilogue stays in f32.
    # TODO(synk): on v7x, fp8 weights (+ per-layer f32 scale in the epilogue)
    # would cut the dominant weight DMA another 2x vs bf16.
    """
    if num_layers > 0:
        w_in_ref, w_hid_ref, w_out_ref, b_ref, o_ref, xpad_ref = refs
    else:
        w_in_ref, w_out_ref, b_ref, o_ref, xpad_ref = refs
        w_hid_ref = None

    hid_pad = w_in_ref.shape[1]
    out_pad = w_out_ref.shape[1]

    # In-kernel K padding of the activation (replaces the old per-call
    # host-side zeros+set materialization): zero only the pad tail, then copy.
    if d_in < xpad_ref.shape[1]:
        xpad_ref[:, d_in:] = jnp.zeros(
            (xpad_ref.shape[0], xpad_ref.shape[1] - d_in), xpad_ref.dtype)
    xpad_ref[:, :d_in] = x_ref[...]

    b_all = b_ref[...]  # (padded_rows, 128) f32 -- one tiny load, static row slices

    # Input layer.
    h = jnp.dot(xpad_ref[...].astype(jnp.bfloat16), w_in_ref[...],
                preferred_element_type=jnp.float32)
    h = h + b_all[0:1, :hid_pad]
    h = jnp.maximum(h, NEG_SLOPE * h)          # leaky_relu: mul+max, no select

    # Hidden layers, statically unrolled; activations stay in vregs.
    for l in range(num_layers):
        h = jnp.dot(h.astype(jnp.bfloat16), w_hid_ref[l],
                    preferred_element_type=jnp.float32)
        h = h + b_all[1 + l:2 + l, :hid_pad]
        h = jnp.maximum(h, NEG_SLOPE * h)

    # Output layer (no activation). Lane-dense (multiple-of-128) store.
    y = jnp.dot(h.astype(jnp.bfloat16), w_out_ref[...],
                preferred_element_type=jnp.float32)
    y = y + b_all[num_layers + 1:num_layers + 2, :out_pad]
    o_ref[...] = y.astype(o_ref.dtype)


def init_mlp_params(key, hidden_size, num_layers, input_shape=310, output_shape=20):
    """Deterministic synthetic parameters (uniform, like torch's default init),
    in the natural (unpadded) f32 shapes — used by the pure-JAX reference."""
    dims = [(input_shape, hidden_size)]
    dims += [(hidden_size, hidden_size) for _ in range(num_layers)]
    dims += [(hidden_size, output_shape)]
    params = []
    for (d_in, d_out) in dims:
        key, kw, kb = jax.random.split(key, 3)
        bound = 1.0 / (d_in ** 0.5)
        w = jax.random.uniform(kw, (d_in, d_out), jnp.float32, -bound, bound)
        b = jax.random.uniform(kb, (d_out,), jnp.float32, -bound, bound)
        params.append((w, b))
    return params


def prepare_params(params, *, input_shape, hidden_size, output_shape):
    """One-time padding/packing to lane-dense, kernel-ready arrays.

    Weights are stored in bf16 (forward is weight-DMA bound, not FLOP bound);
    biases stay f32 for the f32 epilogue.  Zero padding keeps the math exact:
    padded rows/cols contribute 0, padded bias lanes are 0, and
    leaky_relu(0) == 0, so padding never contaminates the valid columns.
    """
    num_layers = len(params) - 2
    d_in_pad = _round_up(input_shape, LANE)
    hid_pad = _round_up(hidden_size, LANE)
    out_pad = _round_up(output_shape, LANE)
    # TODO(synk): on v6e/v7x with large hidden sizes, pad N to 256 (2x256x256 MXU).
    b_width = max(hid_pad, out_pad)
    # Bias lane-slicing in the kernel relies on this coupling:
    assert b_width >= hid_pad and b_width >= out_pad
    b_rows = _round_up(num_layers + 2, SUBLANE)

    (w_in, b_in) = params[0]
    (w_out, b_out) = params[-1]

    w_in_p = jnp.zeros((d_in_pad, hid_pad), jnp.bfloat16)
    w_in_p = w_in_p.at[:input_shape, :hidden_size].set(w_in.astype(jnp.bfloat16))

    w_out_p = jnp.zeros((hid_pad, out_pad), jnp.bfloat16)
    w_out_p = w_out_p.at[:hidden_size, :output_shape].set(w_out.astype(jnp.bfloat16))

    if num_layers > 0:
        w_hid_p = jnp.zeros((num_layers, hid_pad, hid_pad), jnp.bfloat16)
        for l in range(num_layers):
            w_hid_p = w_hid_p.at[l, :hidden_size, :hidden_size].set(
                params[1 + l][0].astype(jnp.bfloat16))
    else:
        w_hid_p = None   # no dummy stack: avoids a pointless DMA + VMEM buffer

    # All biases packed into one (8-row-padded, 128-lane) f32 block: one tiny DMA.
    b_p = jnp.zeros((b_rows, b_width), jnp.float32)
    b_p = b_p.at[0, :hidden_size].set(b_in)
    for l in range(num_layers):
        b_p = b_p.at[1 + l, :hidden_size].set(params[1 + l][1])
    b_p = b_p.at[num_layers + 1, :output_shape].set(b_out)

    return {"w_in": w_in_p, "w_hid": w_hid_p, "w_out": w_out_p, "b": b_p}


def mlp_forward(packed, x, *, num_layers, output_shape):
    """Single pallas_call for the whole MLP.  x is the UNPADDED (B, input_shape)
    array; K-padding happens in-kernel.  Returns (B, output_shape)."""
    w_in, w_out, b = packed["w_in"], packed["w_out"], packed["b"]
    w_hid = packed["w_hid"]
    B, d_in = x.shape
    d_in_pad, hid_pad = w_in.shape
    out_pad = w_out.shape[1]
    x = x.astype(jnp.float32)

    # Batch tiling: one grid step for small batches; MAX_BATCH_TILE-row tiles
    # ("parallel" -> sharded across v7x's 2 TensorCores) for large ones.
    # Weight index_maps ignore the batch index, so Pallas fetches them once.
    tb = min(_round_up(B, SUBLANE), MAX_BATCH_TILE)
    nb = pl.cdiv(B, tb)

    # Everything stays resident in VMEM; estimate the footprint and set an
    # explicit limit (v7x: 64 MiB physical / 32 MiB scoped default vs 128 MiB
    # physical on v5e/v6e).
    w_bytes = w_in.size * 2 + w_out.size * 2 + b.size * 4
    if num_layers > 0:
        w_bytes += w_hid.size * 2
    est = 2 * (w_bytes + tb * d_in * 4 + tb * out_pad * 4) + tb * d_in_pad * 4
    vmem_limit = max(32 << 20, min(int(est * 3 // 2), 64 << 20))
    # TODO(synk): if the weight stack outgrows the v7x budget, switch to a
    # layer-axis "arbitrary" grid / pltpu.emit_pipeline (2 resident layer bufs).

    in_specs = [
        pl.BlockSpec((tb, d_in), lambda i: (i, 0)),    # batch-tiled input
        pl.BlockSpec(w_in.shape, lambda i: (0, 0)),    # weights: batch-invariant
    ]
    args = [x, w_in]
    if num_layers > 0:
        in_specs.append(pl.BlockSpec(w_hid.shape, lambda i: (0, 0, 0)))
        args.append(w_hid)
    in_specs += [
        pl.BlockSpec(w_out.shape, lambda i: (0, 0)),
        pl.BlockSpec(b.shape, lambda i: (0, 0)),
    ]
    args += [w_out, b]

    kernel = functools.partial(_fused_mlp_kernel, num_layers=num_layers, d_in=d_in)
    out = pl.pallas_call(
        kernel,
        out_shape=jax.ShapeDtypeStruct((B, out_pad), jnp.float32),
        grid=(nb,),
        in_specs=in_specs,
        out_specs=pl.BlockSpec((tb, out_pad), lambda i: (i, 0)),
        scratch_shapes=[pltpu.VMEM((tb, d_in_pad), jnp.float32)],
        compiler_params=pltpu.CompilerParams(
            dimension_semantics=("parallel",),
            vmem_limit_bytes=vmem_limit),
    )(*args)
    # TODO(synk): if this is called every decode step, add a cross-call weight
    # prefetch pallas_call (SEMAPHORE+VMEM outputs) to hide the weight DMA.

    # Slice the lane-dense (B, 128) result back to the logical output width.
    return out[:, :output_shape]


def mlp_reference(params, x, *, weight_dtype=jnp.float32, act_dtype=jnp.float32):
    """Pure-JAX reference.  With weight_dtype/act_dtype = bfloat16 it mirrors the
    kernel's quantization exactly (bf16 operands, exact f32 products/accum)."""
    hp = jax.lax.Precision.HIGHEST
    h = x
    for (w, b) in params[:-1]:
        y = jnp.dot(h.astype(act_dtype).astype(jnp.float32),
                    w.astype(weight_dtype).astype(jnp.float32), precision=hp) + b
        h = jnp.where(y >= 0, y, NEG_SLOPE * y)
    w, b = params[-1]
    return jnp.dot(h.astype(act_dtype).astype(jnp.float32),
                   w.astype(weight_dtype).astype(jnp.float32), precision=hp) + b


if __name__ == "__main__":
    batch = 8
    hidden_size = 32
    num_layers = 2
    input_shape = 310
    output_shape = 20

    key = jax.random.PRNGKey(0)
    key, kx = jax.random.split(key)
    x = jax.random.normal(kx, (batch, input_shape), jnp.float32)
    params = init_mlp_params(key, hidden_size, num_layers, input_shape, output_shape)

    # One-time padding/packing + bf16 cast (zero runtime cost on the forward path).
    packed = prepare_params(params, input_shape=input_shape,
                            hidden_size=hidden_size, output_shape=output_shape)

    fwd = jax.jit(functools.partial(mlp_forward, num_layers=num_layers,
                                    output_shape=output_shape))
    out = jax.block_until_ready(fwd(packed, x))
    assert out.shape == (batch, output_shape), out.shape

    # Tight check vs a reference that mirrors the kernel's bf16 weight/activation
    # quantization (remaining delta is accumulation order only).
    ref_bf16 = mlp_reference(params, x, weight_dtype=jnp.bfloat16,
                             act_dtype=jnp.bfloat16)
    assert jnp.allclose(out, ref_bf16, atol=2e-3, rtol=2e-3), "mismatch vs bf16 reference"

    # Loose sanity check vs the full-f32 module semantics (bf16 weights are the
    # only intentional deviation).
    ref_f32 = mlp_reference(params, x)
    assert jnp.allclose(out, ref_f32, atol=5e-2, rtol=5e-2), "mismatch vs f32 reference"

    print("KERNEL_OK")
</pallas_src>

<mosaic_0001>
module attributes {stable_mosaic.version = 11 : i64} {
  func.func @_fused_mlp_kernel(%arg0: i32, %arg1: memref<8x310xf32, #tpu.memory_space<vmem>>, %arg2: memref<384x128xbf16, #tpu.memory_space<vmem>>, %arg3: memref<2x128x128xbf16, #tpu.memory_space<vmem>>, %arg4: memref<128x128xbf16, #tpu.memory_space<vmem>>, %arg5: memref<8x128xf32, #tpu.memory_space<vmem>>, %arg6: memref<8x128xf32, #tpu.memory_space<vmem>>, %arg7: memref<8x384xf32, #tpu.memory_space<vmem>>) attributes {dimension_semantics = [#tpu.dimension_semantics<parallel>], iteration_bounds = array<i64: 1>, scalar_prefetch = 0 : i64, scratch_operands = 1 : i64, tpu.core_type = #tpu.core_type<tc>, window_params = [{transform_indices = @transform_0, window_bounds = array<i64: 8, 310>}, {pipeline_mode = #tpu.pipeline_mode<synchronous>, transform_indices = @transform_1, window_bounds = array<i64: 384, 128>}, {pipeline_mode = #tpu.pipeline_mode<synchronous>, transform_indices = @transform_2, window_bounds = array<i64: 2, 128, 128>}, {pipeline_mode = #tpu.pipeline_mode<synchronous>, transform_indices = @transform_3, window_bounds = array<i64: 128, 128>}, {pipeline_mode = #tpu.pipeline_mode<synchronous>, transform_indices = @transform_4, window_bounds = array<i64: 8, 128>}, {transform_indices = @transform_5, window_bounds = array<i64: 8, 128>}]} {
    %cst = arith.constant 0.000000e+00 : f32
    %0 = vector.broadcast %cst : f32 to vector<8x74xf32>
    %c0 = arith.constant 0 : index
    %c310 = arith.constant 310 : index
    %1 = vector.load %arg7[%c0, %c310] : memref<8x384xf32, #tpu.memory_space<vmem>>, vector<8x74xf32>
    tpu.vector_store %arg7[%c0, %c310], %0 {strides = array<i32>} : memref<8x384xf32, #tpu.memory_space<vmem>>, vector<8x74xf32>,
    %c0_0 = arith.constant 0 : index
    %c0_1 = arith.constant 0 : index
    %2 = vector.load %arg1[%c0_0, %c0_1] : memref<8x310xf32, #tpu.memory_space<vmem>>, vector<8x310xf32>
    %c0_2 = arith.constant 0 : index
    %c0_3 = arith.constant 0 : index
    %3 = vector.load %arg7[%c0_2, %c0_3] : memref<8x384xf32, #tpu.memory_space<vmem>>, vector<8x310xf32>
    tpu.vector_store %arg7[%c0_2, %c0_3], %2 {strides = array<i32>} : memref<8x384xf32, #tpu.memory_space<vmem>>, vector<8x310xf32>,
    %c0_4 = arith.constant 0 : index
    %c0_5 = arith.constant 0 : index
    %4 = vector.load %arg5[%c0_4, %c0_5] : memref<8x128xf32, #tpu.memory_space<vmem>>, vector<8x128xf32>
    %c0_6 = arith.constant 0 : index
    %c0_7 = arith.constant 0 : index
    %5 = vector.load %arg7[%c0_6, %c0_7] : memref<8x384xf32, #tpu.memory_space<vmem>>, vector<8x384xf32>
    %6 = arith.truncf %5 : vector<8x384xf32> to vector<8x384xbf16>
    %c0_8 = arith.constant 0 : index
    %c0_9 = arith.constant 0 : index
    %7 = vector.load %arg2[%c0_8, %c0_9] : memref<384x128xbf16, #tpu.memory_space<vmem>>, vector<384x128xbf16>
    %cst_10 = arith.constant dense<0.000000e+00> : vector<8x128xf32>
    %8 = tpu.matmul %6, %7, %cst_10 {dimension_numbers = #tpu.dot_dimension_numbers<[1], [0], [0], [1], [0, 0, 1, 1], [], []>} : vector<8x384xbf16>, vector<384x128xbf16>, vector<8x128xf32> -> vector<8x128xf32>
    %9 = vector.extract_strided_slice %4 {offsets = [0, 0], sizes = [1, 128], strides = [1, 1]} : vector<8x128xf32> to vector<1x128xf32>
    %10 = vector.broadcast %9 : vector<1x128xf32> to vector<8x128xf32>
    %11 = arith.addf %8, %10 : vector<8x128xf32>
    %cst_11 = arith.constant 0.00999999977 : f32
    %12 = vector.broadcast %cst_11 : f32 to vector<8x128xf32>
    %13 = arith.mulf %12, %11 : vector<8x128xf32>
    %14 = arith.maximumf %11, %13 : vector<8x128xf32>
    %15 = arith.truncf %14 : vector<8x128xf32> to vector<8x128xbf16>
    %c0_12 = arith.constant 0 : index
    %c0_13 = arith.constant 0 : index
    %c0_14 = arith.constant 0 : index
    %16 = vector.load %arg3[%c0_12, %c0_13, %c0_14] : memref<2x128x128xbf16, #tpu.memory_space<vmem>>, vector<1x128x128xbf16>
    %17 = vector.shape_cast %16 : vector<1x128x128xbf16> to vector<128x128xbf16>
    %cst_15 = arith.constant dense<0.000000e+00> : vector<8x128xf32>
    %18 = tpu.matmul %15, %17, %cst_15 {dimension_numbers = #tpu.dot_dimension_numbers<[1], [0], [0], [1], [0, 0, 1, 1], [], []>} : vector<8x128xbf16>, vector<128x128xbf16>, vector<8x128xf32> -> vector<8x128xf32>
    %19 = vector.extract_strided_slice %4 {offsets = [1, 0], sizes = [1, 128], strides = [1, 1]} : vector<8x128xf32> to vector<1x128xf32>
    %20 = vector.broadcast %19 : vector<1x128xf32> to vector<8x128xf32>
    %21 = arith.addf %18, %20 : vector<8x128xf32>
    %cst_16 = arith.constant 0.00999999977 : f32
    %22 = vector.broadcast %cst_16 : f32 to vector<8x128xf32>
    %23 = arith.mulf %22, %21 : vector<8x128xf32>
    %24 = arith.maximumf %21, %23 : vector<8x128xf32>
    %25 = arith.truncf %24 : vector<8x128xf32> to vector<8x128xbf16>
    %c1 = arith.constant 1 : index
    %c0_17 = arith.constant 0 : index
    %c0_18 = arith.constant 0 : index
    %26 = vector.load %arg3[%c1, %c0_17, %c0_18] : memref<2x128x128xbf16, #tpu.memory_space<vmem>>, vector<1x128x128xbf16>
    %27 = vector.shape_cast %26 : vector<1x128x128xbf16> to vector<128x128xbf16>
    %cst_19 = arith.constant dense<0.000000e+00> : vector<8x128xf32>
    %28 = tpu.matmul %25, %27, %cst_19 {dimension_numbers = #tpu.dot_dimension_numbers<[1], [0], [0], [1], [0, 0, 1, 1], [], []>} : vector<8x128xbf16>, vector<128x128xbf16>, vector<8x128xf32> -> vector<8x128xf32>
    %29 = vector.extract_strided_slice %4 {offsets = [2, 0], sizes = [1, 128], strides = [1, 1]} : vector<8x128xf32> to vector<1x128xf32>
    %30 = vector.broadcast %29 : vector<1x128xf32> to vector<8x128xf32>
    %31 = arith.addf %28, %30 : vector<8x128xf32>
    %cst_20 = arith.constant 0.00999999977 : f32
    %32 = vector.broadcast %cst_20 : f32 to vector<8x128xf32>
    %33 = arith.mulf %32, %31 : vector<8x128xf32>
    %34 = arith.maximumf %31, %33 : vector<8x128xf32>
    %35 = arith.truncf %34 : vector<8x128xf32> to vector<8x128xbf16>
    %c0_21 = arith.constant 0 : index
    %c0_22 = arith.constant 0 : index
    %36 = vector.load %arg4[%c0_21, %c0_22] : memref<128x128xbf16, #tpu.memory_space<vmem>>, vector<128x128xbf16>
    %cst_23 = arith.constant dense<0.000000e+00> : vector<8x128xf32>
    %37 = tpu.matmul %35, %36, %cst_23 {dimension_numbers = #tpu.dot_dimension_numbers<[1], [0], [0], [1], [0, 0, 1, 1], [], []>} : vector<8x128xbf16>, vector<128x128xbf16>, vector<8x128xf32> -> vector<8x128xf32>
    %38 = vector.extract_strided_slice %4 {offsets = [3, 0], sizes = [1, 128], strides = [1, 1]} : vector<8x128xf32> to vector<1x128xf32>
    %39 = vector.broadcast %38 : vector<1x128xf32> to vector<8x128xf32>
    %40 = arith.addf %37, %39 : vector<8x128xf32>
    %c0_24 = arith.constant 0 : index
    %c0_25 = arith.constant 0 : index
    %41 = vector.load %arg6[%c0_24, %c0_25] : memref<8x128xf32, #tpu.memory_space<vmem>>, vector<8x128xf32>
    tpu.vector_store %arg6[%c0_24, %c0_25], %40 {strides = array<i32>} : memref<8x128xf32, #tpu.memory_space<vmem>>, vector<8x128xf32>,
    return
  }
  func.func @transform_0(%arg0: i32) -> (i32, i32) {
    %c0_i32 = arith.constant 0 : i32
    %c0_i32_0 = arith.constant 0 : i32
    return %arg0, %c0_i32 : i32, i32
  }
  func.func @transform_1(%arg0: i32) -> (i32, i32) {
    %c0_i32 = arith.constant 0 : i32
    %c0_i32_0 = arith.constant 0 : i32
    %c0_i32_1 = arith.constant 0 : i32
    return %c0_i32, %c0_i32_0 : i32, i32
  }
  func.func @transform_2(%arg0: i32) -> (i32, i32, i32) {
    %c0_i32 = arith.constant 0 : i32
    %c0_i32_0 = arith.constant 0 : i32
    %c0_i32_1 = arith.constant 0 : i32
    %c0_i32_2 = arith.constant 0 : i32
    return %c0_i32, %c0_i32_0, %c0_i32_1 : i32, i32, i32
  }
  func.func @transform_3(%arg0: i32) -> (i32, i32) {
    %c0_i32 = arith.constant 0 : i32
    %c0_i32_0 = arith.constant 0 : i32
    %c0_i32_1 = arith.constant 0 : i32
    return %c0_i32, %c0_i32_0 : i32, i32
  }
  func.func @transform_4(%arg0: i32) -> (i32, i32) {
    %c0_i32 = arith.constant 0 : i32
    %c0_i32_0 = arith.constant 0 : i32
    %c0_i32_1 = arith.constant 0 : i32
    return %c0_i32, %c0_i32_0 : i32, i32
  }
  func.func @transform_5(%arg0: i32) -> (i32, i32) {
    %c0_i32 = arith.constant 0 : i32
    %c0_i32_0 = arith.constant 0 : i32
    return %arg0, %c0_i32 : i32, i32
  }
}

</mosaic_0001>

<bundles_post_ra>
// kernel: mlp_forward.1
= control target key start
LH: loop header
LB: loop body
LE: loop exit
PB: predicated region body
PF: predicated region fallthrough
CT: control target
= control target key end

     0   :  { %10 = vsyncpa [#allocation4], 0  ;;  %s1071_s0 = inlined_call_operand.hbm [shape: f32[8,310], index: 0, kind: input, shape index: {}]   ;;  %s1072_s1 = inlined_call_operand.hbm [shape: bf16[384,128], index: 1, kind: input, shape index: {}]   ;;  %s1073_s2 = inlined_call_operand.hbm [shape: bf16[2,128,128], index: 2, kind: input, shape index: {}]   ;;  %s1074_s3 = inlined_call_operand.hbm [shape: bf16[128,128], index: 3, kind: input, shape index: {}]   ;;  %s1075_s4 = inlined_call_operand.hbm [shape: f32[8,128], index: 4, kind: input, shape index: {}]   ;;  %s1076_s5 = inlined_call_operand.hbm [shape: f32[8,128], index: 5, kind: output, shape index: {}]  }
   0x1   :  { %11 = vsyncpa [#allocation7], 0 }
   0x2   :  { %12 = vsyncpa [#allocation10], 0  ;;  %s29_s20 = sshll.u32 %s1072_s1, 4  ;;  %s30_s20 = int_to_ptr.hbm [resolvable:$true] %s29_s20 }
   0x3   :  { %13 = vsyncpa [#allocation5], 0  ;;  %s1008_s21 = smov [#allocation6]   ;;  %s55_s25 = sshll.u32 %s1074_s3, 4  ;;  %s56_s25 = int_to_ptr.hbm [resolvable:$true] %s55_s25 }
   0x4   :  { %s31_s22 = sshll.u32 %s1008_s21, 4  ;;  %s1009_s26 = smov 64   ;;  %s32_s22 = int_to_ptr.vmem [resolvable:$true] %s31_s22 }
   0x5   :  { %s1010_s27 = smov 4   ;;  %s1011_s28 = smov [#allocation9]  }
   0x6   :  { %37 = dma.hbm_to_vmem [thread:$0]  %s30_s20, 3072, %s32_s22, [#allocation7], %s1009_s26, %s1009_s26, %s1010_s27  }
   0x7   :  { %s57_s29 = sshll.u32 %s1011_s28, 4  ;;  %s19_s7 = sshll.u32 %s1071_s0, 4  ;;  %s58_s29 = int_to_ptr.vmem [resolvable:$true] %s57_s29  ;;  %s20_s7 = int_to_ptr.hbm [resolvable:$true] %s19_s7 }
   0x8   :  { %63 = dma.hbm_to_vmem [thread:$0]  %s56_s25, 1024, %s58_s29, [#allocation10], %s1009_s26, %s1009_s26, %s1010_s27  }
   0x9   :  { %s42_s9 = sshll.u32 %s1073_s2, 4  ;;  %s1012_s10 = smov [#allocation3]   ;;  %s43_s9 = int_to_ptr.hbm [resolvable:$true] %s42_s9 }
   0xa   :  { %s21_s11 = sshll.u32 %s1012_s10, 4  ;;  %s1013_s3 = smov [#allocation8]   ;;  %s22_s11 = int_to_ptr.vmem [resolvable:$true] %s21_s11 }
   0xb   :  { %24 = dma.hbm_to_vmem [thread:$0]  %s20_s7, 384, %s22_s11, [#allocation4]  }
   0xc   :  { %s44_s12 = sshll.u32 %s1013_s3, 4  ;;  %s69_s15 = sshll.u32 %s1075_s4, 4  ;;  %s45_s12 = int_to_ptr.vmem [resolvable:$true] %s44_s12  ;;  %s70_s15 = int_to_ptr.hbm [resolvable:$true] %s69_s15 }
   0xd   :  { %50 = dma.hbm_to_vmem [thread:$0]  %s43_s9, 2048, %s45_s12, [#allocation7], %s1009_s26, %s1009_s26, %s1010_s27  }
   0xe   :  { %s1014_s0 = smov [#allocation11]  }
   0xf   :  { %s71_s16 = sshll.u32 %s1014_s0, 4  ;;  %s72_s16 = int_to_ptr.vmem [resolvable:$true] %s71_s16 }
  0x10   :  { %74 = dma.hbm_to_vmem [thread:$0]  %s70_s15, 128, %s72_s16, [#allocation10]  }
  0x11   :  { %1000 = dma.done.wait [#allocation4], 384  }
  0x12   :  { %1001 = vsyncadd [#allocation4], 4294966912 }
  0x13   :  { %1002 = dma.done.wait [#allocation7], 5120  }
  0x14   :  { %1003 = vsyncadd [#allocation7], 4294962176 }
  0x15   :  { %1004 = dma.done.wait [#allocation10], 1152  }
  0x16   :  { %1005 = vsyncadd [#allocation10], 4294966144  ;;  %vm95_vm0 = vcmask 1047984   ;;  %v1015_v0 = vmov 0.0   ;;  %v806_v1 = vld [vmem:[#allocation6 + $0x38] sm:$0xff]  ;;  %v805_v4 = vld [vmem:[#allocation6 + $0x30] sm:$0xff] }
  0x17   :  { %96 = vst.msk [vmem:[#allocation2 + $0x10] sm:$0xff] %vm95_vm0, %v1015_v0  ;;  %v814_v2 = vld [vmem:[#allocation6 + $0x78] sm:$0xff]  ;;  %304 = vmatpush.bf16.msra.mxu0 %v806_v1  ;;  %v813_v5 = vld [vmem:[#allocation6 + $0x70] sm:$0xff]  ;;  %v804_v7 = vld [vmem:[#allocation6 + $0x28] sm:$0xff]  ;;  %vm102_vm1 = vcmask 441344   ;;  %s1016_s2 = smov [#allocation12]  }
  0x18   :  { %v822_v3 = vld [vmem:[#allocation6 + $0xb8] sm:$0xff]  ;;  %317 = vmatpush.bf16.msra.mxu1 %v814_v2  ;;  %v821_v6 = vld [vmem:[#allocation6 + $0xb0] sm:$0xff]  ;;  %v812_v8 = vld [vmem:[#allocation6 + $0x68] sm:$0xff]  ;;  %s593_s4 = sshll.u32 %s1016_s2, 4  ;;  %s595_s19 = sshll.u32 %s1076_s5, 4  ;;  %s594_s4 = int_to_ptr.vmem [resolvable:$true] %s593_s4  ;;  %s596_s19 = int_to_ptr.hbm [resolvable:$true] %s595_s19 }
  0x19   :  { %330 = vmatpush.bf16.msra.mxu2 %v822_v3  ;;  %v820_v9 = vld [vmem:[#allocation6 + $0xa8] sm:$0xff]  ;;  %v99_v11 = vld [vmem:[#allocation3 + $0x10] sm:$0xff]  ;;  %v98_v12 = vld [vmem:[#allocation3 + $0x8] sm:$0xff] }
  0x1a   :  { %v97_v10 = vld [vmem:[#allocation3] sm:$0xff]  ;;  %v830_v13 = vld [vmem:[#allocation8 + $0x38] sm:$0xff]  ;;  %v803_v14 = vld [vmem:[#allocation6 + $0x20] sm:$0xff]  ;;  %103 = vst.msk [vmem:[#allocation2 + $0x10] sm:$0xff] %vm102_vm1, %v99_v11  ;;  %v109_v34 = vpack.c.bf16 %v98_v12, %v98_v12 }
  0x1b   :  { %305 = vmatpush.bf16.msra.mxu0 %v805_v4  ;;  %v811_v15 = vld [vmem:[#allocation6 + $0x60] sm:$0xff]  ;;  %411 = vmatpush.bf16.msra.mxu3 %v830_v13  ;;  %v829_v17 = vld [vmem:[#allocation8 + $0x30] sm:$0xff]  ;;  %v802_v18 = vld [vmem:[#allocation6 + $0x18] sm:$0xff]  ;;  %v108_v33 = vpack.c.bf16 %v97_v10, %v97_v10 }
  0x1c   :  { %318 = vmatpush.bf16.msra.mxu1 %v813_v5  ;;  %v819_v16 = vld [vmem:[#allocation6 + $0xa0] sm:$0xff]  ;;  %v810_v19 = vld [vmem:[#allocation6 + $0x58] sm:$0xff]  ;;  %v828_v21 = vld [vmem:[#allocation8 + $0x28] sm:$0xff] }
  0x1d   :  { %331 = vmatpush.bf16.msra.mxu2 %v821_v6  ;;  %v818_v20 = vld [vmem:[#allocation6 + $0x98] sm:$0xff]  ;;  %v801_v22 = vld [vmem:[#allocation6 + $0x10] sm:$0xff]  ;;  %v827_v25 = vld [vmem:[#allocation8 + $0x20] sm:$0xff] }
  0x1e   :  { %v809_v23 = vld [vmem:[#allocation6 + $0x50] sm:$0xff]  ;;  %v800_v26 = vld [vmem:[#allocation6 + $0x8] sm:$0xff]  ;;  %v799_v29 = vld [vmem:[#allocation6] sm:$0xff] }
  0x1f   :  { %306 = vmatpush.bf16.msra.mxu0 %v804_v7  ;;  %412 = vmatpush.bf16.msra.mxu3 %v829_v17  ;;  %v817_v24 = vld [vmem:[#allocation6 + $0x90] sm:$0xff]  ;;  %v808_v27 = vld [vmem:[#allocation6 + $0x48] sm:$0xff]  ;;  %v807_v30 = vld [vmem:[#allocation6 + $0x40] sm:$0xff] }
  0x20   :  { %319 = vmatpush.bf16.msra.mxu1 %v812_v8  ;;  %v816_v28 = vld [vmem:[#allocation6 + $0x88] sm:$0xff]  ;;  %v815_v31 = vld [vmem:[#allocation6 + $0x80] sm:$0xff]  ;;  %v826_v36 = vld [vmem:[#allocation8 + $0x18] sm:$0xff] }
  0x21   :  { %332 = vmatpush.bf16.msra.mxu2 %v820_v9  ;;  %v107_v32 = vld [vmem:[#allocation2 + $0x10] sm:$0xff]  ;;  %v825_v37 = vld [vmem:[#allocation8 + $0x10] sm:$0xff]  ;;  %v824_v38 = vld [vmem:[#allocation8 + $0x8] sm:$0xff] }
  0x22   :  { %v110_v35 = vpack.c.bf16 %v107_v32, %v107_v32  ;;  %v823_v39 = vld [vmem:[#allocation8] sm:$0xff]  ;;  %v838_v40 = vld [vmem:[#allocation8 + $0x78] sm:$0xff]  ;;  %v837_v41 = vld [vmem:[#allocation8 + $0x70] sm:$0xff] }
  0x23   :  { %307 = vmatpush.bf16.msra.mxu0 %v803_v14  ;;  %413 = vmatpush.bf16.msra.mxu3 %v828_v21  ;;  %v836_v42 = vld [vmem:[#allocation8 + $0x68] sm:$0xff]  ;;  %v1062_v43 = vld [vmem:[#allocation11] sm:$0xff]  ;;  %v834_v46 = vld [vmem:[#allocation8 + $0x58] sm:$0xff] }
  0x24   :  { %320 = vmatpush.bf16.msra.mxu1 %v811_v15  ;;  %v835_v44 = vld [vmem:[#allocation8 + $0x60] sm:$0xff]  ;;  %v159_v45 = vperm.slane %v1062_v43, 0  ;;  %v833_v50 = vld [vmem:[#allocation8 + $0x50] sm:$0xff]  ;;  %v832_v60 = vld [vmem:[#allocation8 + $0x48] sm:$0xff]  ;;  %v362_v4 = vperm.slane %v1062_v43, 1  ;;  %v444_v13 = vperm.slane %v1062_v43, 2 }
  0x25   :  { %333 = vmatpush.bf16.msra.mxu2 %v819_v16  ;;  %v831_v61 = vld [vmem:[#allocation8 + $0x40] sm:$0xff]  ;;  %v846_v62 = vld [vmem:[#allocation9 + $0x38] sm:$0xff]  ;;  %v845_v63 = vld [vmem:[#allocation9 + $0x30] sm:$0xff] }
  0x26   :  { %v844_v0 = vld [vmem:[#allocation9 + $0x28] sm:$0xff]  ;;  %v843_v1 = vld [vmem:[#allocation9 + $0x20] sm:$0xff]  ;;  %v842_v2 = vld [vmem:[#allocation9 + $0x18] sm:$0xff] }
  0x27   :  { %308 = vmatpush.bf16.msra.mxu0 %v802_v18  ;;  %414 = vmatpush.bf16.msra.mxu3 %v827_v25  ;;  %v841_v3 = vld [vmem:[#allocation9 + $0x10] sm:$0xff]  ;;  %v840_v11 = vld [vmem:[#allocation9 + $0x8] sm:$0xff]  ;;  %v839_v12 = vld [vmem:[#allocation9] sm:$0xff] }
  0x28   :  { %321 = vmatpush.bf16.msra.mxu1 %v810_v19 }
  0x29   :  { %334 = vmatpush.bf16.msra.mxu2 %v818_v20  ;;  %v525_v20 = vperm.slane %v1062_v43, 3 }
  0x2b   :  { %309 = vmatpush.bf16.msra.mxu0 %v801_v22  ;;  %415 = vmatpush.bf16.msra.mxu3 %v826_v36 }
  0x2c   :  { %322 = vmatpush.bf16.msra.mxu1 %v809_v23 }
  0x2d   :  { %335 = vmatpush.bf16.msra.mxu2 %v817_v24 }
  0x2f   :  { %310 = vmatpush.bf16.msra.mxu0 %v800_v26  ;;  %416 = vmatpush.bf16.msra.mxu3 %v825_v37 }
  0x30   :  { %323 = vmatpush.bf16.msra.mxu1 %v808_v27 }
  0x31   :  { %336 = vmatpush.bf16.msra.mxu2 %v816_v28 }
  0x33   :  { %311 = vmatpush.bf16.msra.mxu0 %v799_v29  ;;  %417 = vmatpush.bf16.msra.mxu3 %v824_v38 }
  0x34   :  { %324 = vmatpush.bf16.msra.mxu1 %v807_v30 }
  0x35   :  { %337 = vmatpush.bf16.msra.mxu2 %v815_v31 }
  0x36   :  { %312 = vmatmul.bf16.vlgmr.msra.gmra.mxu0 %v108_v33 }
  0x37   :  { %325 = vmatmul.bf16.vlgmr.msra.gmra.mxu1 %v109_v34  ;;  %418 = vmatpush.bf16.msra.mxu3 %v823_v39 }
  0x38   :  { %338 = vmatmul.bf16.vlgmr.msra.gmra.mxu2 %v110_v35  ;;  %493 = vmatpush.bf16.msrb.mxu0 %v838_v40 }
  0x39   :  { %574 = vmatpush.bf16.msrb.mxu1 %v846_v62 }
  0x3c   :  { %494 = vmatpush.bf16.msrb.mxu0 %v837_v41 }
  0x3d   :  { %575 = vmatpush.bf16.msrb.mxu1 %v845_v63 }
  0x40   :  { %495 = vmatpush.bf16.msrb.mxu0 %v836_v42 }
  0x41   :  { %576 = vmatpush.bf16.msrb.mxu1 %v844_v0 }
  0x44   :  { %496 = vmatpush.bf16.msrb.mxu0 %v835_v44 }
  0x45   :  { %577 = vmatpush.bf16.msrb.mxu1 %v843_v1 }
  0x48   :  { %497 = vmatpush.bf16.msrb.mxu0 %v834_v46 }
  0x49   :  { %578 = vmatpush.bf16.msrb.mxu1 %v842_v2 }
  0x4c   :  { %498 = vmatpush.bf16.msrb.mxu0 %v833_v50 }
  0x4d   :  { %579 = vmatpush.bf16.msrb.mxu1 %v841_v3 }
  0x50   :  { %499 = vmatpush.bf16.msrb.mxu0 %v832_v60 }
  0x51   :  { %580 = vmatpush.bf16.msrb.mxu1 %v840_v11 }
  0x54   :  { %500 = vmatpush.bf16.msrb.mxu0 %v831_v61 }
  0x55   :  { %581 = vmatpush.bf16.msrb.mxu1 %v839_v12 }
  0xb3   :  { %v313_v47 = vpop.f32.mrf.mxu0 }
  0xb4   :  { %v326_v48 = vpop.f32.mrf.mxu1  ;;  %v314_v49 = vadd.f32 %v313_v47, %v159_v45 }
  0xb6   :  { %v327_v51 = vadd.f32 %v326_v48, %v314_v49 }
  0xbb   :  { %v339_v52 = vpop.f32.mrf.mxu2  ;;  %v315_v54 = vpop.f32.mrf.mxu0 }
  0xbc   :  { %v340_v53 = vadd.f32 %v339_v52, %v327_v51  ;;  %v328_v55 = vpop.f32.mrf.mxu1 }
  0xbe   :  { %v343_v56 = vmul.f32 0.01, %v340_v53 }
  0xc0   :  { %v344_v57 = vmax.f32 %v340_v53, %v343_v56 }
  0xc2   :  { %v345_v58 = vpack.c.bf16 %v344_v57, %v344_v57 }
  0xc3   :  { %v341_v59 = vpop.f32.mrf.mxu2 }
  0xc4   :  { %419 = vmatmul.bf16.vlgmr.msra.gmra.mxu3 %v345_v58 }
 0x147   :  { %v420_v5 = vpop.f32.mrf.mxu3 }
 0x148   :  { %v421_v6 = vadd.f32 %v420_v5, %v362_v4 }
 0x14a   :  { %v424_v7 = vmul.f32 0.01, %v421_v6 }
 0x14c   :  { %v425_v8 = vmax.f32 %v421_v6, %v424_v7 }
 0x14e   :  { %v426_v9 = vpack.c.bf16 %v425_v8, %v425_v8 }
 0x14f   :  { %v422_v10 = vpop.f32.mrf.mxu3 }
 0x150   :  { %501 = vmatmul.bf16.vlgmr.msrb.gmra.mxu0 %v426_v9 }
 0x1cd   :  { %v502_v14 = vpop.f32.mrf.mxu0 }
 0x1ce   :  { %v503_v15 = vadd.f32 %v502_v14, %v444_v13 }
 0x1d0   :  { %v506_v16 = vmul.f32 0.01, %v503_v15 }
 0x1d2   :  { %v507_v17 = vmax.f32 %v503_v15, %v506_v16 }
 0x1d4   :  { %v508_v18 = vpack.c.bf16 %v507_v17, %v507_v17 }
 0x1d5   :  { %v504_v19 = vpop.f32.mrf.mxu0 }
 0x1d6   :  { %582 = vmatmul.bf16.vlgmr.msrb.gmra.mxu1 %v508_v18 }
 0x253   :  { %v583_v21 = vpop.f32.mrf.mxu1 }
 0x254   :  { %v584_v22 = vadd.f32 %v583_v21, %v525_v20 }
 0x256   :  { %587 = vst [vmem:[#allocation12] sm:$0xff] %v584_v22 }
 0x257   :  { %598 = dma.vmem_to_hbm [thread:$0]  %s594_s4, 128, %s596_s19, [#allocation5]  }
 0x25b   :  { %v585_v23 = vpop.f32.mrf.mxu1 }
 0x25c   :  { %1006 = dma.done.wait [#allocation5], 128  }
 0x25d   :  { %1007 = vsyncadd [#allocation5], 4294967168 }
 0x25e   :  { %603 = vsyncpa [#allocation4], 1 }
 0x25f   :  { %604 = vsyncpa [#allocation7], 1 }
 0x260   :  { %605 = vsyncpa [#allocation10], 1 }
 0x261   :  { %606 = vsyncpa [#allocation5], 1 }

</bundles_post_ra>
